<compile_context>
chip_gen: v7x
topology: tpu7x:2x2x1
jax: 0.10.0
libtpu: 0.0.40
codegen_flags: <defaults>
</compile_context>

<pallas_src>
import math
import functools

import jax
import jax.numpy as jnp
from jax.experimental import pallas as pl
from jax.experimental.pallas import tpu as pltpu


def _round_up(x: int, m: int) -> int:
    return ((x + m - 1) // m) * m


# -----------------------------------------------------------------------------
# Kernel (transposed, batch-on-lanes)
# -----------------------------------------------------------------------------
def _net_kernel(xt_ref,
                w0_ref, b0_ref,
                w1_ref, b1_ref,
                w2_ref, b2_ref,
                wo_ref, bo_ref,
                o_ref,
                *,
                output_shape: int,
                allow_negative_weights: bool,
                scale: float,      # (_max_weight - _min_weight)
                offset: float):    # (_min_weight + 1/output_shape)
    """All activations are kept as (features, batch_tile): feature widths sit
    on the sublane axis, the batch tile fills the 128-lane axis."""

    def linear_t(h, w_ref, b_ref):
        # h: (d_in, tb); w: (d_out, d_in) bf16 (PyTorch orientation);
        # b: (d_out, 1) f32.  bf16 operands on the MXU (the cast is a cheap
        # VPU op), f32 accumulation, bias broadcast along lanes.
        return (jnp.dot(w_ref[...], h.astype(jnp.bfloat16),
                        preferred_element_type=jnp.float32)
                + b_ref[...])

    def elu(h):
        # F.elu(alpha=1.0): h if h > 0 else exp(h) - 1.
        # exp(h)-1 (not expm1): guaranteed Mosaic lowering; the cancellation
        # near 0 is far below the bf16 matmul-operand noise floor.
        return jnp.where(h > 0.0, h, jnp.exp(h) - 1.0)

    h = xt_ref[...]                                  # (in_dim, tb) bf16
    h = elu(linear_t(h, w0_ref, b0_ref))
    h = elu(linear_t(h, w1_ref, b1_ref))
    h = elu(linear_t(h, w2_ref, b2_ref))
    logits = linear_t(h, wo_ref, bo_ref)             # (output_shape, tb) f32

    if output_shape == 1:
        if allow_negative_weights:
            out = jnp.tanh(logits)
        else:
            out = 1.0 / (1.0 + jnp.exp(-logits))
    else:
        # softmax over the small (sublane) feature axis, exact normalization
        m = jnp.max(logits, axis=0, keepdims=True)   # (1, tb)
        e = jnp.exp(logits - m)                      # (output_shape, tb)
        s = jnp.sum(e, axis=0, keepdims=True)        # (1, tb)
        sm = e * (1.0 / s)                           # exact: columns sum to 1
        out = scale * sm + offset

    o_ref[...] = out.astype(o_ref.dtype)


# -----------------------------------------------------------------------------
# Parameter construction (mirrors nn.Linear default init).
# Weights are stored in PyTorch orientation (out_features, in_features), bf16
# (deliberate MXU-operand precision trade); biases as (out_features, 1) f32
# (lane-broadcast orientation for the transposed kernel).
# -----------------------------------------------------------------------------
def init_params(key, input_shape, output_shape, layer_sizes):
    params = []
    last = input_shape
    for d in list(layer_sizes) + [output_shape]:
        key, kw, kb = jax.random.split(key, 3)
        bound = 1.0 / math.sqrt(last)
        w = jax.random.uniform(kw, (d, last), jnp.float32, -bound, bound)
        b = jax.random.uniform(kb, (d, 1), jnp.float32, -bound, bound)
        params.append((w.astype(jnp.bfloat16), b))
        last = d
    return params


# -----------------------------------------------------------------------------
# Wrapper
# -----------------------------------------------------------------------------
def net_forward(x, params, *, output_shape,
                max_weight=1.0, min_weight=0.0,
                block_batch=2048):
    """x: (batch, input_shape) f32 -> (batch, output_shape) f32."""
    assert len(params) == 4, "expects 3 hidden layers + output layer"
    batch, in_dim = x.shape

    allow_negative_weights = min_weight < 0
    _max_weight = max_weight - 1.0 / output_shape
    _min_weight = min_weight - 1.0 / output_shape
    scale = _max_weight - _min_weight
    offset = _min_weight + 1.0 / output_shape

    # Batch-on-lanes layout: a single fused XLA pass transposes x to
    # (in_dim, batch) and casts to bf16; the kernel then reads x exactly once
    # from HBM at 2 B/elt.  No jnp.pad pass (boundary blocks are masked).
    xt = x.astype(jnp.bfloat16).T                    # (in_dim, batch)

    # Lane-axis batch tiles: multiples of 128 (or the full extent for tiny
    # batches).  Large tiles amortize per-grid-step overhead; keep >= 2 steps
    # when possible so the grid shards across v7x's two TensorCores.
    if batch <= 256:
        tb = batch
        nblocks = 1
    else:
        tb = min(_round_up(block_batch, 128), _round_up(pl.cdiv(batch, 2), 128))
        nblocks = pl.cdiv(batch, tb)   # partial tail block: OOB reads are
                                       # isolated per-column, OOB stores masked

    kernel = functools.partial(
        _net_kernel,
        output_shape=output_shape,
        allow_negative_weights=allow_negative_weights,
        scale=scale,
        offset=offset,
    )

    flat = []
    for w, b in params:
        flat.extend([w, b])

    # x^T / out tiled along the lane (batch) axis; weights & biases full-extent
    # blocks with constant index_maps -> resident in VMEM across the grid.
    in_specs = [pl.BlockSpec((in_dim, tb), lambda i: (0, i))]
    for arr in flat:
        in_specs.append(pl.BlockSpec(arr.shape, lambda i: (0, 0)))
    out_specs = pl.BlockSpec((output_shape, tb), lambda i: (0, i))

    # Advisory cost estimate for XLA's scheduler (true kernel HBM traffic).
    dims = [in_dim] + [w.shape[0] for (w, _) in params]
    flops = 2 * batch * sum(a * b for a, b in zip(dims[:-1], dims[1:]))
    transcendentals = batch * (sum(dims[1:]) + 1)
    bytes_accessed = (batch * in_dim * 2              # x^T (bf16), read once
                      + batch * output_shape * 4      # out (f32)
                      + sum(w.size * 2 + b.size * 4 for (w, b) in params))

    out_t = pl.pallas_call(
        kernel,
        out_shape=jax.ShapeDtypeStruct((output_shape, batch), jnp.float32),
        grid=(nblocks,),
        in_specs=in_specs,
        out_specs=out_specs,
        compiler_params=pltpu.CompilerParams(
            dimension_semantics=("parallel",)),
        cost_estimate=pl.CostEstimate(
            flops=int(flops),
            transcendentals=int(transcendentals),
            bytes_accessed=int(bytes_accessed)),
    )(xt, *flat)

    return out_t.T                                   # (batch, output_shape)


# -----------------------------------------------------------------------------
# Pure-JAX reference (same bf16-operand / f32-accumulate numerics)
# -----------------------------------------------------------------------------
def net_forward_ref(x, params, *, output_shape, max_weight=1.0, min_weight=0.0):
    h = x.astype(jnp.bfloat16)
    for (w, b) in params[:-1]:
        z = jnp.dot(h.astype(jnp.bfloat16), w.T,
                    preferred_element_type=jnp.float32) + b.reshape(1, -1)
        h = jnp.where(z > 0, z, jnp.exp(z) - 1.0)
    wo, bo = params[-1]
    logits = jnp.dot(h.astype(jnp.bfloat16), wo.T,
                     preferred_element_type=jnp.float32) + bo.reshape(1, -1)
    _max_w = max_weight - 1.0 / output_shape
    _min_w = min_weight - 1.0 / output_shape
    if output_shape == 1:
        return jnp.tanh(logits) if min_weight < 0 else jax.nn.sigmoid(logits)
    sm = jax.nn.softmax(logits, axis=1)
    return (_max_w - _min_w) * sm + _min_w + 1.0 / output_shape


# -----------------------------------------------------------------------------
# Main
# -----------------------------------------------------------------------------
if __name__ == "__main__":
    INPUT_SHAPE = 16     # number of input features
    OUTPUT_SHAPE = 4     # number of assets (softmax branch)
    LAYER_SIZES = [8, 16, 8]
    BATCH = 512          # -> 2 lane-dense grid steps of 256 (exercises the
                         #    pipeline and the v7x 2-TensorCore sharding path)

    key = jax.random.PRNGKey(0)
    key, kx = jax.random.split(key)
    x = jax.random.normal(kx, (BATCH, INPUT_SHAPE), jnp.float32)

    params = init_params(key, INPUT_SHAPE, OUTPUT_SHAPE, LAYER_SIZES)

    out = net_forward(x, params, output_shape=OUTPUT_SHAPE)
    out = jax.block_until_ready(out)

    ref = net_forward_ref(x, params, output_shape=OUTPUT_SHAPE)
    assert out.shape == (BATCH, OUTPUT_SHAPE)
    max_err = jnp.max(jnp.abs(out - ref))
    assert jnp.allclose(out, ref, atol=5e-3, rtol=5e-3), \
        f"mismatch: max abs err {max_err}"
    # allocation weights sum to ~1 per row (default max/min weight config);
    # exact softmax normalization -> tight tolerance
    assert jnp.allclose(jnp.sum(out, axis=1), 1.0, atol=1e-3)

    print("KERNEL_OK")
</pallas_src>

<mosaic_0001>
module attributes {stable_mosaic.version = 11 : i64} {
  func.func @_net_kernel(%arg0: i32, %arg1: memref<16x256xbf16, #tpu.memory_space<vmem>>, %arg2: memref<8x16xbf16, #tpu.memory_space<vmem>>, %arg3: memref<8x1xf32, #tpu.memory_space<vmem>>, %arg4: memref<16x8xbf16, #tpu.memory_space<vmem>>, %arg5: memref<16x1xf32, #tpu.memory_space<vmem>>, %arg6: memref<8x16xbf16, #tpu.memory_space<vmem>>, %arg7: memref<8x1xf32, #tpu.memory_space<vmem>>, %arg8: memref<4x8xbf16, #tpu.memory_space<vmem>>, %arg9: memref<4x1xf32, #tpu.memory_space<vmem>>, %arg10: memref<4x256xf32, #tpu.memory_space<vmem>>) attributes {dimension_semantics = [#tpu.dimension_semantics<parallel>], iteration_bounds = array<i64: 2>, scalar_prefetch = 0 : i64, scratch_operands = 0 : i64, tpu.core_type = #tpu.core_type<tc>, window_params = [{transform_indices = @transform_0, window_bounds = array<i64: 16, 256>}, {pipeline_mode = #tpu.pipeline_mode<synchronous>, transform_indices = @transform_1, window_bounds = array<i64: 8, 16>}, {pipeline_mode = #tpu.pipeline_mode<synchronous>, transform_indices = @transform_2, window_bounds = array<i64: 8, 1>}, {pipeline_mode = #tpu.pipeline_mode<synchronous>, transform_indices = @transform_3, window_bounds = array<i64: 16, 8>}, {pipeline_mode = #tpu.pipeline_mode<synchronous>, transform_indices = @transform_4, window_bounds = array<i64: 16, 1>}, {pipeline_mode = #tpu.pipeline_mode<synchronous>, transform_indices = @transform_5, window_bounds = array<i64: 8, 16>}, {pipeline_mode = #tpu.pipeline_mode<synchronous>, transform_indices = @transform_6, window_bounds = array<i64: 8, 1>}, {pipeline_mode = #tpu.pipeline_mode<synchronous>, transform_indices = @transform_7, window_bounds = array<i64: 4, 8>}, {pipeline_mode = #tpu.pipeline_mode<synchronous>, transform_indices = @transform_8, window_bounds = array<i64: 4, 1>}, {transform_indices = @transform_9, window_bounds = array<i64: 4, 256>}]} {
    %c0 = arith.constant 0 : index
    %c0_0 = arith.constant 0 : index
    %0 = vector.load %arg1[%c0, %c0_0] : memref<16x256xbf16, #tpu.memory_space<vmem>>, vector<16x256xbf16>
    %c0_1 = arith.constant 0 : index
    %c0_2 = arith.constant 0 : index
    %1 = vector.load %arg2[%c0_1, %c0_2] : memref<8x16xbf16, #tpu.memory_space<vmem>>, vector<8x16xbf16>
    %cst = arith.constant dense<0.000000e+00> : vector<8x256xf32>
    %2 = tpu.matmul %1, %0, %cst {dimension_numbers = #tpu.dot_dimension_numbers<[1], [0], [0], [1], [0, 0, 1, 1], [], []>} : vector<8x16xbf16>, vector<16x256xbf16>, vector<8x256xf32> -> vector<8x256xf32>
    %c0_3 = arith.constant 0 : index
    %c0_4 = arith.constant 0 : index
    %3 = vector.load %arg3[%c0_3, %c0_4] : memref<8x1xf32, #tpu.memory_space<vmem>>, vector<8x1xf32>
    %4 = vector.broadcast %3 : vector<8x1xf32> to vector<8x256xf32>
    %5 = arith.addf %2, %4 : vector<8x256xf32>
    %cst_5 = arith.constant 0.000000e+00 : f32
    %6 = vector.broadcast %cst_5 : f32 to vector<8x256xf32>
    %7 = arith.cmpf ogt, %5, %6 : vector<8x256xf32>
    %8 = math.exp %5 : vector<8x256xf32>
    %cst_6 = arith.constant 1.000000e+00 : f32
    %9 = vector.broadcast %cst_6 : f32 to vector<8x256xf32>
    %10 = arith.subf %8, %9 : vector<8x256xf32>
    %11 = arith.select %7, %5, %10 : vector<8x256xi1>, vector<8x256xf32>
    %c0_7 = arith.constant 0 : index
    %c0_8 = arith.constant 0 : index
    %12 = vector.load %arg4[%c0_7, %c0_8] : memref<16x8xbf16, #tpu.memory_space<vmem>>, vector<16x8xbf16>
    %13 = arith.truncf %11 : vector<8x256xf32> to vector<8x256xbf16>
    %cst_9 = arith.constant dense<0.000000e+00> : vector<16x256xf32>
    %14 = tpu.matmul %12, %13, %cst_9 {dimension_numbers = #tpu.dot_dimension_numbers<[1], [0], [0], [1], [0, 0, 1, 1], [], []>} : vector<16x8xbf16>, vector<8x256xbf16>, vector<16x256xf32> -> vector<16x256xf32>
    %c0_10 = arith.constant 0 : index
    %c0_11 = arith.constant 0 : index
    %15 = vector.load %arg5[%c0_10, %c0_11] : memref<16x1xf32, #tpu.memory_space<vmem>>, vector<16x1xf32>
    %16 = vector.broadcast %15 : vector<16x1xf32> to vector<16x256xf32>
    %17 = arith.addf %14, %16 : vector<16x256xf32>
    %cst_12 = arith.constant 0.000000e+00 : f32
    %18 = vector.broadcast %cst_12 : f32 to vector<16x256xf32>
    %19 = arith.cmpf ogt, %17, %18 : vector<16x256xf32>
    %20 = math.exp %17 : vector<16x256xf32>
    %cst_13 = arith.constant 1.000000e+00 : f32
    %21 = vector.broadcast %cst_13 : f32 to vector<16x256xf32>
    %22 = arith.subf %20, %21 : vector<16x256xf32>
    %23 = arith.select %19, %17, %22 : vector<16x256xi1>, vector<16x256xf32>
    %c0_14 = arith.constant 0 : index
    %c0_15 = arith.constant 0 : index
    %24 = vector.load %arg6[%c0_14, %c0_15] : memref<8x16xbf16, #tpu.memory_space<vmem>>, vector<8x16xbf16>
    %25 = arith.truncf %23 : vector<16x256xf32> to vector<16x256xbf16>
    %cst_16 = arith.constant dense<0.000000e+00> : vector<8x256xf32>
    %26 = tpu.matmul %24, %25, %cst_16 {dimension_numbers = #tpu.dot_dimension_numbers<[1], [0], [0], [1], [0, 0, 1, 1], [], []>} : vector<8x16xbf16>, vector<16x256xbf16>, vector<8x256xf32> -> vector<8x256xf32>
    %c0_17 = arith.constant 0 : index
    %c0_18 = arith.constant 0 : index
    %27 = vector.load %arg7[%c0_17, %c0_18] : memref<8x1xf32, #tpu.memory_space<vmem>>, vector<8x1xf32>
    %28 = vector.broadcast %27 : vector<8x1xf32> to vector<8x256xf32>
    %29 = arith.addf %26, %28 : vector<8x256xf32>
    %cst_19 = arith.constant 0.000000e+00 : f32
    %30 = vector.broadcast %cst_19 : f32 to vector<8x256xf32>
    %31 = arith.cmpf ogt, %29, %30 : vector<8x256xf32>
    %32 = math.exp %29 : vector<8x256xf32>
    %cst_20 = arith.constant 1.000000e+00 : f32
    %33 = vector.broadcast %cst_20 : f32 to vector<8x256xf32>
    %34 = arith.subf %32, %33 : vector<8x256xf32>
    %35 = arith.select %31, %29, %34 : vector<8x256xi1>, vector<8x256xf32>
    %c0_21 = arith.constant 0 : index
    %c0_22 = arith.constant 0 : index
    %36 = vector.load %arg8[%c0_21, %c0_22] : memref<4x8xbf16, #tpu.memory_space<vmem>>, vector<4x8xbf16>
    %37 = arith.truncf %35 : vector<8x256xf32> to vector<8x256xbf16>
    %cst_23 = arith.constant dense<0.000000e+00> : vector<4x256xf32>
    %38 = tpu.matmul %36, %37, %cst_23 {dimension_numbers = #tpu.dot_dimension_numbers<[1], [0], [0], [1], [0, 0, 1, 1], [], []>} : vector<4x8xbf16>, vector<8x256xbf16>, vector<4x256xf32> -> vector<4x256xf32>
    %c0_24 = arith.constant 0 : index
    %c0_25 = arith.constant 0 : index
    %39 = vector.load %arg9[%c0_24, %c0_25] : memref<4x1xf32, #tpu.memory_space<vmem>>, vector<4x1xf32>
    %40 = vector.broadcast %39 : vector<4x1xf32> to vector<4x256xf32>
    %41 = arith.addf %38, %40 : vector<4x256xf32>
    %cst_26 = arith.constant dense<0xFF800000> : vector<256xf32>
    %42 = vector.multi_reduction <maximumf>, %41, %cst_26 [0] : vector<4x256xf32> to vector<256xf32>
    %43 = vector.shape_cast %42 : vector<256xf32> to vector<1x256xf32>
    %44 = vector.broadcast %43 : vector<1x256xf32> to vector<4x256xf32>
    %45 = arith.subf %41, %44 : vector<4x256xf32>
    %46 = math.exp %45 : vector<4x256xf32>
    %cst_27 = arith.constant dense<0.000000e+00> : vector<256xf32>
    %47 = vector.multi_reduction <add>, %46, %cst_27 [0] : vector<4x256xf32> to vector<256xf32>
    %48 = vector.shape_cast %47 : vector<256xf32> to vector<1x256xf32>
    %cst_28 = arith.constant 1.000000e+00 : f32
    %49 = vector.broadcast %cst_28 : f32 to vector<1x256xf32>
    %50 = arith.divf %49, %48 : vector<1x256xf32>
    %51 = vector.broadcast %50 : vector<1x256xf32> to vector<4x256xf32>
    %52 = arith.mulf %46, %51 : vector<4x256xf32>
    %cst_29 = arith.constant 1.000000e+00 : f32
    %53 = vector.broadcast %cst_29 : f32 to vector<4x256xf32>
    %54 = arith.mulf %53, %52 : vector<4x256xf32>
    %cst_30 = arith.constant 0.000000e+00 : f32
    %55 = vector.broadcast %cst_30 : f32 to vector<4x256xf32>
    %56 = arith.addf %54, %55 : vector<4x256xf32>
    %c0_31 = arith.constant 0 : index
    %c0_32 = arith.constant 0 : index
    %57 = vector.load %arg10[%c0_31, %c0_32] : memref<4x256xf32, #tpu.memory_space<vmem>>, vector<4x256xf32>
    tpu.vector_store %arg10[%c0_31, %c0_32], %56 {strides = array<i32>} : memref<4x256xf32, #tpu.memory_space<vmem>>, vector<4x256xf32>,
    return
  }
  func.func @transform_0(%arg0: i32) -> (i32, i32) {
    %c0_i32 = arith.constant 0 : i32
    %c0_i32_0 = arith.constant 0 : i32
    return %c0_i32, %arg0 : i32, i32
  }
  func.func @transform_1(%arg0: i32) -> (i32, i32) {
    %c0_i32 = arith.constant 0 : i32
    %c0_i32_0 = arith.constant 0 : i32
    %c0_i32_1 = arith.constant 0 : i32
    return %c0_i32, %c0_i32_0 : i32, i32
  }
  func.func @transform_2(%arg0: i32) -> (i32, i32) {
    %c0_i32 = arith.constant 0 : i32
    %c0_i32_0 = arith.constant 0 : i32
    %c0_i32_1 = arith.constant 0 : i32
    return %c0_i32, %c0_i32_0 : i32, i32
  }
  func.func @transform_3(%arg0: i32) -> (i32, i32) {
    %c0_i32 = arith.constant 0 : i32
    %c0_i32_0 = arith.constant 0 : i32
    %c0_i32_1 = arith.constant 0 : i32
    return %c0_i32, %c0_i32_0 : i32, i32
  }
  func.func @transform_4(%arg0: i32) -> (i32, i32) {
    %c0_i32 = arith.constant 0 : i32
    %c0_i32_0 = arith.constant 0 : i32
    %c0_i32_1 = arith.constant 0 : i32
    return %c0_i32, %c0_i32_0 : i32, i32
  }
  func.func @transform_5(%arg0: i32) -> (i32, i32) {
    %c0_i32 = arith.constant 0 : i32
    %c0_i32_0 = arith.constant 0 : i32
    %c0_i32_1 = arith.constant 0 : i32
    return %c0_i32, %c0_i32_0 : i32, i32
  }
  func.func @transform_6(%arg0: i32) -> (i32, i32) {
    %c0_i32 = arith.constant 0 : i32
    %c0_i32_0 = arith.constant 0 : i32
    %c0_i32_1 = arith.constant 0 : i32
    return %c0_i32, %c0_i32_0 : i32, i32
  }
  func.func @transform_7(%arg0: i32) -> (i32, i32) {
    %c0_i32 = arith.constant 0 : i32
    %c0_i32_0 = arith.constant 0 : i32
    %c0_i32_1 = arith.constant 0 : i32
    return %c0_i32, %c0_i32_0 : i32, i32
  }
  func.func @transform_8(%arg0: i32) -> (i32, i32) {
    %c0_i32 = arith.constant 0 : i32
    %c0_i32_0 = arith.constant 0 : i32
    %c0_i32_1 = arith.constant 0 : i32
    return %c0_i32, %c0_i32_0 : i32, i32
  }
  func.func @transform_9(%arg0: i32) -> (i32, i32) {
    %c0_i32 = arith.constant 0 : i32
    %c0_i32_0 = arith.constant 0 : i32
    return %c0_i32, %arg0 : i32, i32
  }
}

</mosaic_0001>

<bundles_post_ra>
// kernel: tpu_custom_call.1
= control target key start
LH: loop header
LB: loop body
LE: loop exit
PB: predicated region body
PF: predicated region fallthrough
CT: control target
= control target key end

     0   :  { %14 = vsyncpa [#allocation4], 0  ;;  %s1159_s0 = inlined_call_operand.vmem [shape: bf16[16,512], index: 0, kind: input, shape index: {}]   ;;  %s1160_s1 = inlined_call_operand.vmem [shape: bf16[8,16], index: 1, kind: input, shape index: {}]   ;;  %s1161_s2 = inlined_call_operand.vmem [shape: f32[8,1], index: 2, kind: input, shape index: {}]   ;;  %s1162_s3 = inlined_call_operand.vmem [shape: bf16[16,8], index: 3, kind: input, shape index: {}]   ;;  %s1163_s4 = inlined_call_operand.vmem [shape: f32[16,1], index: 4, kind: input, shape index: {}]   ;;  %s1164_s5 = inlined_call_operand.vmem [shape: bf16[8,16], index: 5, kind: input, shape index: {}]   ;;  %s1165_s6 = inlined_call_operand.vmem [shape: f32[8,1], index: 6, kind: input, shape index: {}]   ;;  %s1166_s7 = inlined_call_operand.vmem [shape: bf16[4,8], index: 7, kind: input, shape index: {}]   ;;  %s1167_s8 = inlined_call_operand.vmem [shape: f32[4,1], index: 8, kind: input, shape index: {}]   ;;  %s1168_s9 = inlined_call_operand.hbm [shape: f32[4,512], index: 9, kind: output, shape index: {}]  }
   0x1   :  { %16 = vsyncpa [#allocation4 + $0x1], 0  ;;  %s1010_s30 = smov 0   ;;  %s1012_s10 = smov 0  }
   0x2   :  { %s1014_s11 = smov 0   ;;  %s1016_s12 = smov 0  }
   0x3 LB: > { %s790_s13 = sadd.s32 4294967295, %s956_s12   ;;  %s791_s14 = sadd.s32 4294967294, %s956_s12   ;;  %s956_s12 = sphi %s1016_s12, %s1174_s12   ;;  %s952_s11 = sphi %s1014_s11, %s1173_s11   ;;  %s948_s10 = sphi %s1012_s10, %s1172_s10   ;;  %s944_s30 = sphi %s1010_s30, %s1171_s30  }
   0x4   : > { %s1033_s15 = sadd.s32 1, %s956_s12   ;;  %s29_s16 = sadd.s32 1, %s952_s11 }
   0x5   : > { %s26_s17 = ssub.s32 %s956_s12, %s1033_s15  ;;  %p36_p0 = scmp.ne.s32.totalorder %s952_s11, %s948_s10 }
   0x6   : > { %p27_p1 = scmp.eq.s32.totalorder %s26_s17, 0  ;;  %p37_p2 = scmp.eq.s32.totalorder %s956_s12, 0 }
   0x7   : > { %p234_p3 = scmp.eq.s32.totalorder %s790_s13, 1  ;;  %p239_p4 = scmp.ne.s32.totalorder %s948_s10, %s944_s30 }
   0x8   : > { %s1046_s18 = scalar_select %p27_p1, %s952_s11, %s29_s16  }
   0x9   : > { %p38_p5 = por %p37_p2, %p36_p0  ;;  %p1048_p6 = por %p234_p3, %p36_p0 }
   0xa   : > { %p240_p7 = scmp.eq.s32.totalorder %s791_s14, 1  ;;  %p793_p9 = scmp.ge.s32.totalorder %s956_s12, 2 }
   0xc   : > { %p1052_p8 = por %p240_p7, %p239_p4  ;;  %280 = sbr.rel (%p793_p9) target bundleno = 26 (0x1a), region = 48 }
  0x13   : > { %283 = sbr.rel (!%p38_p5) target bundleno = 26 (0x1a), region = 52  ;;  %s285_s21 = sand.u32 (%p38_p5), 1, %s952_s11  }
  0x14   : > { %s822_s22 = sshll.u32 (%p38_p5), %s956_s12, 3  ;;  %s794_s23 = sshll.u32 (%p38_p5), %s285_s21, 4 }
  0x15   : > { %s290_s26 = scalar_lea.vmem (%p38_p5), %s1159_s0, %s822_s22  ;;  %s287_s27 = scalar_lea.vmem (%p38_p5), [#allocation2], %s794_s23 }
  0x16   : > { %v320_v0 = vld [vmem:[%s290_s26] sm:$0xff] (%p38_p5)  ;;  %v322_v1 = vld [vmem:[%s290_s26 + $0x10] sm:$0xff] (%p38_p5) }
  0x17   : > { %321 = vst [vmem:[%s287_s27] sm:$0xff] (%p38_p5), %v320_v0  ;;  %323 = vst [vmem:[%s287_s27 + $0x8] sm:$0xff] (%p38_p5), %v322_v1 }
  0x1a PF: > { %p797_p10 = scmp.ge.s32.totalorder %s956_s12, 1  ;;  %p328_p11 = scmp.lt.s32.totalorder %s956_s12, 3 }
  0x1c   : > { %p329_p12 = pnand %p797_p10, %p328_p11 }
  0x1d   : > { %s1067_s28 = sand.u32 (!%p329_p12), 1, %s948_s10   ;;  %v376_v2 = vld [vmem:[%s1161_s2] sm:$0xff] (!%p329_p12)  ;;  %v958_v3 = vmov (!%p329_p12), 0   ;;  %vm392_vm0 = vcmask (!%p329_p12), 130048   ;;  %v452_v9 = vld [vmem:[%s1163_s4 + $0x8] sm:$0xff] (!%p329_p12)  ;;  %vm472_vm3 = vcmask (!%p329_p12), 1043456  }
  0x1e   : > { %332 = sbr.rel (%p329_p12) target bundleno = 1035 (0x40b), region = 90  ;;  %s798_s16 = sshll.u32 (!%p329_p12), %s1067_s28, 4  ;;  %428 = vmatprep.mubr.bf16.mxu0 (!%p329_p12), %v958_v3  ;;  %864 = vset.pattern.permute.xlu0 (!%p329_p12), %v958_v3  ;;  %v451_v4 = vld [vmem:[%s1163_s4] sm:$0xff] (!%p329_p12)  ;;  %vm468_vm4 = vcmask (!%p329_p12), 64512  }
  0x1f   : > { %379 = vperm.xlu0 (!%p329_p12), %864, %v376_v2   ;;  %511 = vmatprep.mubr.bf16.mxu1 (!%p329_p12), %v958_v3  ;;  %s337_s22 = scalar_lea.vmem (!%p329_p12), [#allocation2], %s798_s16  ;;  %v375_v7 = vld [vmem:[%s1160_s1] sm:$0xf] (!%p329_p12)  ;;  %s799_s26 = sshll.u32 (!%p329_p12), %s1067_s28, 3 }
  0x20   : > { %v866_v5 = vld [vmem:[%s337_s22 + $0x4] ss:$8 sps:$4 sm:$0xff] (!%p329_p12)   ;;  %865 = vset.pattern.permute.xlu1 (!%p329_p12), %v958_v3  ;;  %v868_v6 = vld [vmem:[%s337_s22] ss:$8 sps:$4 sm:$0xff] (!%p329_p12)   ;;  %s823_s27 = sshll.u32 (!%p329_p12), %s790_s13, 7  ;;  %s369_s29 = scalar_lea.vmem (!%p329_p12), [#allocation3], %s799_s26 }
  0x21   : > { %396 = vmatprep.subr.bf16.mxu0 (!%p329_p12), %v866_v5  ;;  %v608_v8 = vld [vmem:[%s1167_s8] sm:$0xf] (!%p329_p12)  ;;  %460 = vperm.xlu1 (!%p329_p12), %865, %v452_v9   ;;  %s726_s14 = sshll.u32 (!%p329_p12), %s369_s29, 4  ;;  %s1115_s21 = scalar_lea.hbm (!%p329_p12), %s1168_s9, %s823_s27  ;;  %s1117_s14 = int_to_ptr.vmem [resolvable:$true] %s726_s14 }
  0x22   : > { %397 = vmatpush1.bf16.msra.mxu0 (!%p329_p12), %v868_v6  ;;  %v545_v10 = vld [vmem:[%s1165_s6] sm:$0xff] (!%p329_p12)  ;;  %s712_s22 = scalar_lea.sflag (!%p329_p12), [#allocation4], %s1067_s28  ;;  %s894_s23 = scalar_lea.vmem (!%p329_p12), %s1117_s14, 128 }
  0x23   : > { %455 = vperm.xlu0 (!%p329_p12), %864, %v451_v4   ;;  %v869_v29 = vld [vmem:[%s1162_s3] sm:$0xff] (!%p329_p12)   ;;  %p895_p13 = scmp.ne.s32.totalorder (!%p329_p12), %s1117_s14, %s894_s23  ;;  %s959_s13 = smov (!%p329_p12), [#allocation3]  }
  0x24   : > { %v542_v58 = vld [vmem:[%s1164_s5] sm:$0xf] (!%p329_p12)  ;;  %s898_s24 = sshll.u32 (!%p329_p12), %s959_s13, 4  ;;  %s899_s24 = int_to_ptr.vmem [resolvable:$false] %s898_s24 }
  0x25   : > { %802 = vmatmul.mubr.msk.bf16.vlgmr.msra.gmra.mrb[0].mxu0 %vm392_vm0, %v375_v7  ;;  %548 = vperm.xlu1 %865, %v545_v10   ;;  %p896_p0 = pnand %p895_p13, %p1048_p6  ;;  %s900_s25 = scalar_lea.vmem %s899_s24, 256 }
  0x26   : > { %586 = vmatprep.mubr.bf16.mxu0 %v958_v3  ;;  %p901_p2 = scmp.lt.s32.totalorder %s1117_s14, %s899_s24  ;;  %p902_p3 = scmp.lt.s32.totalorder %s900_s25, %s894_s23 }
  0x27   : > { %611 = vperm.xlu0 %864, %v608_v8   ;;  %p897_p1 = pneg %p896_p0 }
  0x28   : > { %p903_p4 = por %p902_p3, %p901_p2 }
  0x2a   : > { %p904_p5 = pnand %p903_p4, %p897_p1 }
  0x9e   : > { %v380_v11 = vpop.permute.xlu0 %379 }
  0xa0   : > { %v461_v34 = vpop.permute.xlu1 %460 }
  0xa2   : > { %v456_v30 = vpop.permute.xlu0 %455 }
  0xa4   : > { %v549_v59 = vpop.permute.xlu1 %548 }
  0xf8   : > { %v430_v12 = vpop.f32.mrb[0].mxu0 }
  0xf9   : > { %v431_v13 = vadd.f32 %v430_v12, %v380_v11  ;;  %v432_v14 = vpop.f32.mrb[1].mxu0 }
  0xfa   : > { %v433_v15 = vadd.f32 %v432_v14, %v380_v11  ;;  %v434_v16 = vpop.f32.mrb[2].mxu0  ;;  %v612_v14 = vpop.permute.xlu0 %611 }
  0xfb   : > { %v439_v17 = vmul.f32 1.442695, %v431_v13  ;;  %v435_v18 = vpop.f32.mrb[3].mxu0  ;;  %vm437_vm1 = vcmp.gt.f32.partialorder %v431_v13, 0.0 }
  0xfc   : > { %v441_v19 = vmul.f32 1.442695, %v433_v15  ;;  %vm438_vm2 = vcmp.gt.f32.partialorder %v433_v15, 0.0 }
  0xfd   : > { %870 = vpow2.f32 %v439_v17 }
  0xfe   : > { %872 = vpow2.f32 %v441_v19 }
 0x107   : > { %v871_v20 = vpop.eup %870 }
 0x108   : > { %v873_v21 = vpop.eup %872  ;;  %v803_v22 = vadd.f32 -1.0, %v871_v20 }
 0x109   : > { %v804_v23 = vadd.f32 -1.0, %v873_v21 }
 0x10a   : > { %v445_v24 = vsel %vm437_vm1, %v431_v13, %v803_v22  ;;  %v605_v13 = vld [vmem:[%s1166_s7] sm:$0x3] }
 0x10b   : > { %v446_v25 = vsel %vm438_vm2, %v433_v15, %v804_v23  ;;  %v449_v26 = vpack.c.bf16 %v445_v24, %v445_v24 }
 0x10c   : > { %v450_v27 = vpack.c.bf16 %v446_v25, %v446_v25 }
 0x10d   : > { %v474_v28 = vsel %vm472_vm3, %v449_v26, 0 }
 0x10e   : > { %806 = vmatprep.subr.msk.bf16.mxu1 %vm472_vm3, %v450_v27 }
 0x10f   : > { %480 = vmatpush1.bf16.msra.mxu1 %v474_v28 }
 0x112   : > { %807 = vmatmul.mubr.msk.bf16.vlgmr.msra.gmra.mrb[0].mxu1 %vm468_vm4, %v869_v29 }
 0x113   : > { %655 = vmatprep.mubr.bf16.mxu1 %v958_v3 }
 0x1e5   : > { %v513_v31 = vpop.f32.mrb[0].mxu1 }
 0x1e6   : > { %v514_v32 = vadd.f32 %v513_v31, %v456_v30  ;;  %v515_v33 = vpop.f32.mrb[1].mxu1 }
 0x1e7   : > { %v516_v35 = vadd.f32 %v515_v33, %v456_v30  ;;  %v517_v36 = vpop.f32.mrb[2].mxu1 }
 0x1e8   : > { %v526_v37 = vmul.f32 1.442695, %v514_v32  ;;  %v518_v38 = vadd.f32 %v517_v36, %v461_v34  ;;  %v519_v39 = vpop.f32.mrb[3].mxu1  ;;  %vm522_vm5 = vcmp.gt.f32.partialorder %v514_v32, 0.0 }
 0x1e9   : > { %v528_v40 = vmul.f32 1.442695, %v516_v35  ;;  %v520_v41 = vadd.f32 %v519_v39, %v461_v34  ;;  %vm523_vm7 = vcmp.gt.f32.partialorder %v516_v35, 0.0 }
 0x1ea   : > { %874 = vpow2.f32 %v526_v37  ;;  %v530_v42 = vmul.f32 1.442695, %v518_v38  ;;  %vm524_vm6 = vcmp.gt.f32.partialorder %v518_v38, 0.0 }
 0x1eb   : > { %876 = vpow2.f32 %v528_v40  ;;  %v532_v43 = vmul.f32 1.442695, %v520_v41  ;;  %vm525_vm8 = vcmp.gt.f32.partialorder %v520_v41, 0.0 }
 0x1ec   : > { %878 = vpow2.f32 %v530_v42 }
 0x1ed   : > { %880 = vpow2.f32 %v532_v43 }
 0x1f4   : > { %v875_v44 = vpop.eup %874 }
 0x1f5   : > { %v877_v45 = vpop.eup %876  ;;  %v808_v46 = vadd.f32 -1.0, %v875_v44 }
 0x1f6   : > { %v879_v47 = vpop.eup %878  ;;  %v809_v48 = vadd.f32 -1.0, %v877_v45 }
 0x1f7   : > { %v881_v49 = vpop.eup %880  ;;  %v810_v50 = vadd.f32 -1.0, %v879_v47  ;;  %v538_v52 = vsel %vm522_vm5, %v514_v32, %v808_v46 }
 0x1f8   : > { %v811_v51 = vadd.f32 -1.0, %v881_v49  ;;  %v539_v55 = vsel %vm523_vm7, %v516_v35, %v809_v48 }
 0x1f9   : > { %v540_v53 = vsel %vm524_vm6, %v518_v38, %v810_v50 }
 0x1fa   : > { %v543_v54 = vpack.c.bf16 %v540_v53, %v538_v52  ;;  %v541_v56 = vsel %vm525_vm8, %v520_v41, %v811_v51 }
 0x1fb   : > { %v544_v57 = vpack.c.bf16 %v541_v56, %v539_v55 }
 0x1fd   : > { %554 = vmatprep.subr.bf16.mxu0 %v544_v57 }
 0x1fe   : > { %555 = vmatpush1.bf16.msra.mxu0 %v543_v54 }
 0x201   : > { %812 = vmatmul.mubr.msk.bf16.vlgmr.msra.gmra.mrb[4].mxu0 %vm392_vm0, %v542_v58 }
 0x2d4   : > { %v588_v60 = vpop.f32.mrb[4].mxu0 }
 0x2d5   : > { %v589_v61 = vadd.f32 %v588_v60, %v549_v59  ;;  %v590_v62 = vpop.f32.mrb[5].mxu0 }
 0x2d6   : > { %v591_v63 = vadd.f32 %v590_v62, %v549_v59  ;;  %v592_v0 = vpop.f32.mrb[6].mxu0 }
 0x2d7   : > { %v597_v1 = vmul.f32 1.442695, %v589_v61  ;;  %v593_v2 = vpop.f32.mrb[7].mxu0  ;;  %vm595_vm9 = vcmp.gt.f32.partialorder %v589_v61, 0.0 }
 0x2d8   : > { %v599_v3 = vmul.f32 1.442695, %v591_v63  ;;  %vm596_vm10 = vcmp.gt.f32.partialorder %v591_v63, 0.0 }
 0x2d9   : > { %882 = vpow2.f32 %v597_v1 }
 0x2da   : > { %884 = vpow2.f32 %v599_v3 }
 0x2e3   : > { %v883_v4 = vpop.eup %882 }
 0x2e4   : > { %v885_v5 = vpop.eup %884  ;;  %v813_v6 = vadd.f32 -1.0, %v883_v4 }
 0x2e5   : > { %v814_v7 = vadd.f32 -1.0, %v885_v5 }
 0x2e6   : > { %v603_v8 = vsel %vm595_vm9, %v589_v61, %v813_v6 }
 0x2e7   : > { %v606_v9 = vpack.c.bf16 %v603_v8, %v603_v8  ;;  %v604_v10 = vsel %vm596_vm10, %v591_v63, %v814_v7 }
 0x2e8   : > { %v607_v11 = vpack.c.bf16 %v604_v10, %v604_v10 }
 0x2e9   : > { %v618_v12 = vsel %vm472_vm3, %v606_v9, 0 }
 0x2ea   : > { %815 = vmatprep.subr.msk.bf16.mxu1 %vm472_vm3, %v607_v11 }
 0x2eb   : > { %624 = vmatpush1.bf16.msra.mxu1 %v618_v12 }
 0x2ee   : > { %816 = vmatmul.mubr.msk.bf16.vlgmr.msra.gmra.mrb[4].mxu1 %vm468_vm4, %v605_v13 }
 0x3c1   : > { %v657_v15 = vpop.f32.mrb[4].mxu1 }
 0x3c2   : > { %v658_v16 = vadd.f32 %v657_v15, %v612_v14  ;;  %v659_v17 = vpop.f32.mrb[5].mxu1 }
 0x3c3   : > { %v660_v18 = vadd.f32 %v659_v17, %v612_v14  ;;  %v661_v19 = vpop.f32.mrb[6].mxu1 }
 0x3c4   : > { %v664_v20 = vsel %vm472_vm3, %v658_v16, -inf  ;;  %v662_v21 = vpop.f32.mrb[7].mxu1 }
 0x3c5   : > { %v665_v22 = vrot.slane %v664_v20, 4  ;;  %v671_v23 = vsel %vm472_vm3, %v660_v18, -inf }
 0x3c6   : > { %v672_v24 = vrot.slane %v671_v23, 4 }
 0x3c7   : > { %v666_v25 = vmax.f32 %v664_v20, %v665_v22 }
 0x3c8   : > { %v673_v26 = vmax.f32 %v671_v23, %v672_v24 }
 0x3c9   : > { %v667_v27 = vrot.slane %v666_v25, 2 }
 0x3ca   : > { %v674_v28 = vrot.slane %v673_v26, 2 }
 0x3cb   : > { %v668_v29 = vmax.f32 %v666_v25, %v667_v27 }
 0x3cc   : > { %v675_v30 = vmax.f32 %v673_v26, %v674_v28 }
 0x3cd   : > { %v669_v31 = vrot.slane %v668_v29, 1 }
 0x3ce   : > { %v676_v32 = vrot.slane %v675_v30, 1 }
 0x3cf   : > { %v670_v33 = vmax.f32 %v668_v29, %v669_v31 }
 0x3d0   : > { %v677_v34 = vmax.f32 %v675_v30, %v676_v32 }
 0x3d1   : > { %v678_v35 = vsub.f32 %v658_v16, %v670_v33 }
 0x3d2   : > { %v679_v36 = vsub.f32 %v660_v18, %v677_v34 }
 0x3d3   : > { %v680_v37 = vmul.f32 1.442695, %v678_v35 }
 0x3d4   : > { %v682_v38 = vmul.f32 1.442695, %v679_v36 }
 0x3d5   : > { %886 = vpow2.f32 %v680_v37 }
 0x3d6   : > { %888 = vpow2.f32 %v682_v38 }
 0x3df   : > { %v887_v39 = vpop.eup %886 }
 0x3e0   : > { %v889_v40 = vpop.eup %888  ;;  %v684_v41 = vsel %vm472_vm3, %v887_v39, 0.0 }
 0x3e1   : > { %v685_v42 = vrot.slane %v684_v41, 4  ;;  %v691_v43 = vsel %vm472_vm3, %v889_v40, 0.0 }
 0x3e2   : > { %v692_v44 = vrot.slane %v691_v43, 4 }
 0x3e3   : > { %v686_v45 = vadd.f32 %v685_v42, %v684_v41 }
 0x3e4   : > { %v693_v46 = vadd.f32 %v692_v44, %v691_v43 }
 0x3e5   : > { %v687_v47 = vrot.slane %v686_v45, 2 }
 0x3e6   : > { %v694_v48 = vrot.slane %v693_v46, 2 }
 0x3e7   : > { %v688_v49 = vadd.f32 %v687_v47, %v686_v45 }
 0x3e8   : > { %v695_v50 = vadd.f32 %v694_v48, %v693_v46 }
 0x3e9   : > { %v689_v51 = vrot.slane %v688_v49, 1 }
 0x3ea   : > { %v696_v52 = vrot.slane %v695_v50, 1 }
 0x3eb   : > { %v690_v53 = vadd.f32 %v689_v51, %v688_v49 }
 0x3ec   : > { %v697_v54 = vadd.f32 %v696_v52, %v695_v50 }
 0x3ed   : > { %890 = vrcp.f32 %v690_v53 }
 0x3ee   : > { %892 = vrcp.f32 %v697_v54 }
 0x3f7   : > { %v891_v55 = vpop.eup %890 }
 0x3f8   : > { %v893_v56 = vpop.eup %892  ;;  %v702_v57 = vmul.f32 %v891_v55, %v887_v39 }
 0x3f9   : > { %v703_v58 = vmul.f32 %v893_v56, %v889_v40 }
 0x3fb   : > { %v708_v59 = vcombine.low %v702_v57, %v703_v58 }
 0x3fd   : > { %710 = vst [vmem:[%s369_s29] sm:$0xff] %v708_v59 }
 0x3fe   : > { %907 = shalt.err (!%p904_p5)
}
 0x3ff   : > { %s908_s28 = scalar_lea.hbm %s1115_s21, 128  ;;  %s912_s29 = scalar_lea.hbm %s1168_s9, 256 }
 0x400   : > { %p909_p7 = scmp.ne.s32.totalorder %s1115_s21, %s908_s28  ;;  %p913_p12 = scmp.lt.u32.totalorder %s1115_s21, %s1168_s9 }
 0x401   : > { %p914_p13 = scmp.lt.u32.totalorder %s912_s29, %s908_s28  ;;  %p916_p1 = scmp.lt.u32.totalorder %s908_s28, %s1115_s21 }
 0x402   : > { %p910_p10 = pnand %p909_p7, %p1048_p6 }
 0x403   : > { %p915_p0 = por %p914_p13, %p913_p12 }
 0x404   : > { %p911_p11 = pneg %p910_p10 }
 0x405   : > { %p917_p2 = por %p916_p1, %p915_p0 }
 0x407   : > { %p918_p3 = pnand %p917_p2, %p911_p11 }
 0x409   : > { %921 = shalt.err (!%p918_p3)
}
 0x40a   : > { %824 = dma.vmem_to_hbm [thread:$0]  (%p1048_p6), %s1117_s14, 128, %s1115_s21, %s712_s22  }
 0x40b PF: > { %s738_s23 = sand.u32 1, %s944_s30   ;;  %p827_p4 = pnand %p793_p9, %p1052_p8 }
 0x40c   : > { %s739_s13 = scalar_lea.sflag [#allocation4], %s738_s23 }
 0x40d   : > { %939 = dma.done.wait (!%p827_p4), %s739_s13, 128  }
 0x40e   : > { %941 = vsyncadd (!%p827_p4), %s739_s13, 4294967168  ;;  %p19_p5 = scmp.ge.s32.totalorder %s1033_s15, 4   ;;  %s1171_s30 = smov %s948_s10 }
 0x40f   : > { %s1172_s10 = smov %s952_s11  ;;  %s1173_s11 = smov %s1046_s18 }
 0x410   : > { %s1174_s12 = smov %s1033_s15  ;;  %21 = sbr.rel (!%p19_p5) target bundleno = 3 (0x3), region = 134 }
 0x417   :  { %744 = vsyncpa [#allocation4], 1 }
 0x418   :  { %746 = vsyncpa [#allocation4 + $0x1], 1 }

</bundles_post_ra>
